<compile_context>
chip_gen: v7x
topology: tpu7x:2x2x1
jax: 0.10.0
libtpu: 0.0.40
codegen_flags: <defaults>
</compile_context>

<pallas_src>
import functools

import jax
import jax.numpy as jnp
from jax import lax
from jax.experimental import pallas as pl
from jax.experimental.pallas import tpu as pltpu

LN_EPS = 1e-5


def _ln_act(y, bgb, act):
    """bias-add -> LayerNorm(gamma, beta) -> activation.  bgb is (3, d) rows
    [bias; gamma; beta]; y is (batch, d) in f32."""
    y = y + bgb[0:1, :]                                   # bias
    mean = jnp.mean(y, axis=-1, keepdims=True)
    centered = y - mean
    var = jnp.mean(centered * centered, axis=-1, keepdims=True)
    y = centered * lax.rsqrt(var + LN_EPS)
    y = y * bgb[1:2, :] + bgb[2:3, :]                     # gamma, beta
    if act == "silu":
        y = y * jax.nn.sigmoid(y)                         # stable SiLU (EUP)
    elif act == "relu":
        y = jnp.maximum(y, 0.0)
    else:
        raise ValueError(act)
    return y


def _basic_dnn_kernel(x_ref, enc_w_ref, enc_bgb_ref,
                      blk_w_ref, blk_bgb_ref,
                      out_w_ref, out_bgb_ref,
                      o_ref, *, n_layers, skip_connection):
    """Fully fused forward: encoder -> blocks (+residual) -> output head."""
    x = x_ref[...]

    # Encoder: Linear -> LayerNorm -> SiLU
    h = jnp.dot(x, enc_w_ref[...], preferred_element_type=jnp.float32)
    h = _ln_act(h, enc_bgb_ref[...], "silu")

    # Residual blocks: (Linear -> LayerNorm -> SiLU) [+ h]
    # n_layers is tiny (2) -> static unroll keeps a single basic block.
    for l in range(n_layers):
        y = jnp.dot(h, blk_w_ref[l], preferred_element_type=jnp.float32)
        y = _ln_act(y, blk_bgb_ref[l], "silu")
        h = y + h if skip_connection else y

    # Output head: Dropout(0.1) is identity in eval mode -> Linear -> LN -> ReLU
    # TODO(synk): training-mode stochastic dropout would use pltpu.prng_seed +
    # pltpu.stateful_bernoulli; eval-mode semantics implemented here.
    y = jnp.dot(h, out_w_ref[...], preferred_element_type=jnp.float32)
    y = _ln_act(y, out_bgb_ref[...], "relu")
    o_ref[...] = y.astype(o_ref.dtype)


def pack_params(params):
    """One-time packing: stack block weights, pack (bias, gamma, beta) rows."""
    enc, out, blocks = params["encoder"], params["output"], params["blocks"]
    return dict(
        enc_w=enc["w"],
        enc_bgb=jnp.stack([enc["b"], enc["gamma"], enc["beta"]], axis=0),
        blk_w=jnp.stack([b["w"] for b in blocks], axis=0),
        blk_bgb=jnp.stack(
            [jnp.stack([b["b"], b["gamma"], b["beta"]], axis=0)
             for b in blocks], axis=0),
        out_w=out["w"],
        out_bgb=jnp.stack([out["b"], out["gamma"], out["beta"]], axis=0),
        n_layers=len(blocks),
    )


def basic_dnn_forward(packed, x, *, skip_connection=True):
    """Single fused pallas_call for the whole network."""
    batch = x.shape[0]
    d_out = packed["out_w"].shape[1]

    kernel = functools.partial(_basic_dnn_kernel,
                               n_layers=packed["n_layers"],
                               skip_connection=skip_connection)

    vmem = pl.BlockSpec(memory_space=pltpu.MemorySpace.VMEM)  # full array, VMEM
    return pl.pallas_call(
        kernel,
        out_shape=jax.ShapeDtypeStruct((batch, d_out), x.dtype),
        in_specs=[vmem] * 7,
        out_specs=vmem,
    )(x, packed["enc_w"], packed["enc_bgb"],
      packed["blk_w"], packed["blk_bgb"],
      packed["out_w"], packed["out_bgb"])


def init_params(key, input_size, output_size, hidden_size, n_layers):
    """Deterministic synthetic parameters (PyTorch-shaped semantics)."""
    def linear(key, d_in, d_out):
        kw, kb = jax.random.split(key)
        bound = 1.0 / jnp.sqrt(jnp.float32(d_in))
        w = jax.random.uniform(kw, (d_in, d_out), jnp.float32, -bound, bound)
        b = jax.random.uniform(kb, (d_out,), jnp.float32, -bound, bound)
        return w, b

    keys = jax.random.split(key, n_layers + 2)
    params = {}

    w, b = linear(keys[0], input_size, hidden_size)
    params["encoder"] = dict(w=w, b=b,
                             gamma=jnp.ones((hidden_size,), jnp.float32),
                             beta=jnp.zeros((hidden_size,), jnp.float32))

    params["blocks"] = []
    for l in range(n_layers):
        w, b = linear(keys[1 + l], hidden_size, hidden_size)
        params["blocks"].append(dict(
            w=w, b=b,
            gamma=jnp.ones((hidden_size,), jnp.float32),
            beta=jnp.zeros((hidden_size,), jnp.float32)))

    w, b = linear(keys[-1], hidden_size, output_size)
    params["output"] = dict(w=w, b=b,
                            gamma=jnp.ones((output_size,), jnp.float32),
                            beta=jnp.zeros((output_size,), jnp.float32))
    return params


def reference_forward(params, x, *, skip_connection=True):
    """Pure-JAX reference matching the PyTorch forward (eval mode)."""
    def layer(x, p, act, res):
        y = x @ p["w"] + p["b"]
        mean = jnp.mean(y, -1, keepdims=True)
        var = jnp.mean((y - mean) ** 2, -1, keepdims=True)
        y = (y - mean) / jnp.sqrt(var + LN_EPS) * p["gamma"] + p["beta"]
        y = y * jax.nn.sigmoid(y) if act == "silu" else jnp.maximum(y, 0.0)
        return y + x if res else y

    h = layer(x, params["encoder"], "silu", False)
    for blk in params["blocks"]:
        h = layer(h, blk, "silu", skip_connection)
    return layer(h, params["output"], "relu", False)


if __name__ == "__main__":
    # Small shapes consistent with the module: x is [batch, input_size]
    batch, input_size, hidden_size, output_size, n_layers = 8, 32, 128, 32, 2

    key = jax.random.PRNGKey(0)
    kx, kp = jax.random.split(key)
    x = jax.random.normal(kx, (batch, input_size), jnp.float32)
    params = init_params(kp, input_size, output_size, hidden_size, n_layers)
    packed = pack_params(params)   # one-time weight packing (outside kernel)

    y = basic_dnn_forward(packed, x, skip_connection=True)
    y = jax.block_until_ready(y)

    y_ref = reference_forward(params, x, skip_connection=True)
    assert y.shape == (batch, output_size)
    assert jnp.allclose(y, y_ref, atol=1e-4, rtol=1e-4), "mismatch vs reference"

    print("KERNEL_OK")
</pallas_src>

<mosaic_0001>
module attributes {stable_mosaic.version = 11 : i64} {
  func.func @_basic_dnn_kernel(%arg0: memref<8x32xf32, #tpu.memory_space<vmem>>, %arg1: memref<32x128xf32, #tpu.memory_space<vmem>>, %arg2: memref<3x128xf32, #tpu.memory_space<vmem>>, %arg3: memref<2x128x128xf32, #tpu.memory_space<vmem>>, %arg4: memref<2x3x128xf32, #tpu.memory_space<vmem>>, %arg5: memref<128x32xf32, #tpu.memory_space<vmem>>, %arg6: memref<3x32xf32, #tpu.memory_space<vmem>>, %arg7: memref<8x32xf32, #tpu.memory_space<vmem>>) attributes {dimension_semantics = [], scalar_prefetch = 0 : i64, scratch_operands = 0 : i64, tpu.core_type = #tpu.core_type<tc>} {
    %c0 = arith.constant 0 : index
    %c0_0 = arith.constant 0 : index
    %0 = vector.load %arg0[%c0, %c0_0] : memref<8x32xf32, #tpu.memory_space<vmem>>, vector<8x32xf32>
    %c0_1 = arith.constant 0 : index
    %c0_2 = arith.constant 0 : index
    %1 = vector.load %arg1[%c0_1, %c0_2] : memref<32x128xf32, #tpu.memory_space<vmem>>, vector<32x128xf32>
    %cst = arith.constant dense<0.000000e+00> : vector<8x128xf32>
    %2 = tpu.matmul %0, %1, %cst {dimension_numbers = #tpu.dot_dimension_numbers<[1], [0], [0], [1], [0, 0, 1, 1], [], []>} : vector<8x32xf32>, vector<32x128xf32>, vector<8x128xf32> -> vector<8x128xf32>
    %c0_3 = arith.constant 0 : index
    %c0_4 = arith.constant 0 : index
    %3 = vector.load %arg2[%c0_3, %c0_4] : memref<3x128xf32, #tpu.memory_space<vmem>>, vector<3x128xf32>
    %4 = vector.extract_strided_slice %3 {offsets = [0, 0], sizes = [1, 128], strides = [1, 1]} : vector<3x128xf32> to vector<1x128xf32>
    %5 = vector.broadcast %4 : vector<1x128xf32> to vector<8x128xf32>
    %6 = arith.addf %2, %5 : vector<8x128xf32>
    %cst_5 = arith.constant dense<0.000000e+00> : vector<8xf32>
    %7 = vector.multi_reduction <add>, %6, %cst_5 [1] : vector<8x128xf32> to vector<8xf32>
    %8 = vector.shape_cast %7 : vector<8xf32> to vector<8x1xf32>
    %cst_6 = arith.constant 1.280000e+02 : f32
    %9 = vector.broadcast %cst_6 : f32 to vector<8x1xf32>
    %10 = arith.divf %8, %9 : vector<8x1xf32>
    %11 = vector.broadcast %10 : vector<8x1xf32> to vector<8x128xf32>
    %12 = arith.subf %6, %11 : vector<8x128xf32>
    %13 = arith.mulf %12, %12 : vector<8x128xf32>
    %cst_7 = arith.constant dense<0.000000e+00> : vector<8xf32>
    %14 = vector.multi_reduction <add>, %13, %cst_7 [1] : vector<8x128xf32> to vector<8xf32>
    %15 = vector.shape_cast %14 : vector<8xf32> to vector<8x1xf32>
    %cst_8 = arith.constant 1.280000e+02 : f32
    %16 = vector.broadcast %cst_8 : f32 to vector<8x1xf32>
    %17 = arith.divf %15, %16 : vector<8x1xf32>
    %cst_9 = arith.constant 9.99999974E-6 : f32
    %18 = vector.broadcast %cst_9 : f32 to vector<8x1xf32>
    %19 = arith.addf %17, %18 : vector<8x1xf32>
    %20 = math.rsqrt %19 : vector<8x1xf32>
    %21 = vector.broadcast %20 : vector<8x1xf32> to vector<8x128xf32>
    %22 = arith.mulf %12, %21 : vector<8x128xf32>
    %23 = vector.extract_strided_slice %3 {offsets = [1, 0], sizes = [1, 128], strides = [1, 1]} : vector<3x128xf32> to vector<1x128xf32>
    %24 = vector.broadcast %23 : vector<1x128xf32> to vector<8x128xf32>
    %25 = arith.mulf %22, %24 : vector<8x128xf32>
    %26 = vector.extract_strided_slice %3 {offsets = [2, 0], sizes = [1, 128], strides = [1, 1]} : vector<3x128xf32> to vector<1x128xf32>
    %27 = vector.broadcast %26 : vector<1x128xf32> to vector<8x128xf32>
    %28 = arith.addf %25, %27 : vector<8x128xf32>
    %29 = arith.negf %28 : vector<8x128xf32>
    %30 = math.exp %29 : vector<8x128xf32>
    %cst_10 = arith.constant 1.000000e+00 : f32
    %31 = vector.broadcast %cst_10 : f32 to vector<8x128xf32>
    %32 = arith.addf %31, %30 : vector<8x128xf32>
    %33 = arith.divf %31, %32 : vector<8x128xf32>
    %34 = arith.mulf %28, %33 : vector<8x128xf32>
    %c0_11 = arith.constant 0 : index
    %c0_12 = arith.constant 0 : index
    %c0_13 = arith.constant 0 : index
    %35 = vector.load %arg3[%c0_11, %c0_12, %c0_13] : memref<2x128x128xf32, #tpu.memory_space<vmem>>, vector<1x128x128xf32>
    %36 = vector.shape_cast %35 : vector<1x128x128xf32> to vector<128x128xf32>
    %cst_14 = arith.constant dense<0.000000e+00> : vector<8x128xf32>
    %37 = tpu.matmul %34, %36, %cst_14 {dimension_numbers = #tpu.dot_dimension_numbers<[1], [0], [0], [1], [0, 0, 1, 1], [], []>} : vector<8x128xf32>, vector<128x128xf32>, vector<8x128xf32> -> vector<8x128xf32>
    %c0_15 = arith.constant 0 : index
    %c0_16 = arith.constant 0 : index
    %c0_17 = arith.constant 0 : index
    %38 = vector.load %arg4[%c0_15, %c0_16, %c0_17] : memref<2x3x128xf32, #tpu.memory_space<vmem>>, vector<1x3x128xf32>
    %39 = vector.shape_cast %38 : vector<1x3x128xf32> to vector<3x128xf32>
    %40 = vector.extract_strided_slice %39 {offsets = [0, 0], sizes = [1, 128], strides = [1, 1]} : vector<3x128xf32> to vector<1x128xf32>
    %41 = vector.broadcast %40 : vector<1x128xf32> to vector<8x128xf32>
    %42 = arith.addf %37, %41 : vector<8x128xf32>
    %cst_18 = arith.constant dense<0.000000e+00> : vector<8xf32>
    %43 = vector.multi_reduction <add>, %42, %cst_18 [1] : vector<8x128xf32> to vector<8xf32>
    %44 = vector.shape_cast %43 : vector<8xf32> to vector<8x1xf32>
    %cst_19 = arith.constant 1.280000e+02 : f32
    %45 = vector.broadcast %cst_19 : f32 to vector<8x1xf32>
    %46 = arith.divf %44, %45 : vector<8x1xf32>
    %47 = vector.broadcast %46 : vector<8x1xf32> to vector<8x128xf32>
    %48 = arith.subf %42, %47 : vector<8x128xf32>
    %49 = arith.mulf %48, %48 : vector<8x128xf32>
    %cst_20 = arith.constant dense<0.000000e+00> : vector<8xf32>
    %50 = vector.multi_reduction <add>, %49, %cst_20 [1] : vector<8x128xf32> to vector<8xf32>
    %51 = vector.shape_cast %50 : vector<8xf32> to vector<8x1xf32>
    %cst_21 = arith.constant 1.280000e+02 : f32
    %52 = vector.broadcast %cst_21 : f32 to vector<8x1xf32>
    %53 = arith.divf %51, %52 : vector<8x1xf32>
    %cst_22 = arith.constant 9.99999974E-6 : f32
    %54 = vector.broadcast %cst_22 : f32 to vector<8x1xf32>
    %55 = arith.addf %53, %54 : vector<8x1xf32>
    %56 = math.rsqrt %55 : vector<8x1xf32>
    %57 = vector.broadcast %56 : vector<8x1xf32> to vector<8x128xf32>
    %58 = arith.mulf %48, %57 : vector<8x128xf32>
    %59 = vector.extract_strided_slice %39 {offsets = [1, 0], sizes = [1, 128], strides = [1, 1]} : vector<3x128xf32> to vector<1x128xf32>
    %60 = vector.broadcast %59 : vector<1x128xf32> to vector<8x128xf32>
    %61 = arith.mulf %58, %60 : vector<8x128xf32>
    %62 = vector.extract_strided_slice %39 {offsets = [2, 0], sizes = [1, 128], strides = [1, 1]} : vector<3x128xf32> to vector<1x128xf32>
    %63 = vector.broadcast %62 : vector<1x128xf32> to vector<8x128xf32>
    %64 = arith.addf %61, %63 : vector<8x128xf32>
    %65 = arith.negf %64 : vector<8x128xf32>
    %66 = math.exp %65 : vector<8x128xf32>
    %cst_23 = arith.constant 1.000000e+00 : f32
    %67 = vector.broadcast %cst_23 : f32 to vector<8x128xf32>
    %68 = arith.addf %67, %66 : vector<8x128xf32>
    %69 = arith.divf %67, %68 : vector<8x128xf32>
    %70 = arith.mulf %64, %69 : vector<8x128xf32>
    %71 = arith.addf %70, %34 : vector<8x128xf32>
    %c1 = arith.constant 1 : index
    %c0_24 = arith.constant 0 : index
    %c0_25 = arith.constant 0 : index
    %72 = vector.load %arg3[%c1, %c0_24, %c0_25] : memref<2x128x128xf32, #tpu.memory_space<vmem>>, vector<1x128x128xf32>
    %73 = vector.shape_cast %72 : vector<1x128x128xf32> to vector<128x128xf32>
    %cst_26 = arith.constant dense<0.000000e+00> : vector<8x128xf32>
    %74 = tpu.matmul %71, %73, %cst_26 {dimension_numbers = #tpu.dot_dimension_numbers<[1], [0], [0], [1], [0, 0, 1, 1], [], []>} : vector<8x128xf32>, vector<128x128xf32>, vector<8x128xf32> -> vector<8x128xf32>
    %c1_27 = arith.constant 1 : index
    %c0_28 = arith.constant 0 : index
    %c0_29 = arith.constant 0 : index
    %75 = vector.load %arg4[%c1_27, %c0_28, %c0_29] : memref<2x3x128xf32, #tpu.memory_space<vmem>>, vector<1x3x128xf32>
    %76 = vector.shape_cast %75 : vector<1x3x128xf32> to vector<3x128xf32>
    %77 = vector.extract_strided_slice %76 {offsets = [0, 0], sizes = [1, 128], strides = [1, 1]} : vector<3x128xf32> to vector<1x128xf32>
    %78 = vector.broadcast %77 : vector<1x128xf32> to vector<8x128xf32>
    %79 = arith.addf %74, %78 : vector<8x128xf32>
    %cst_30 = arith.constant dense<0.000000e+00> : vector<8xf32>
    %80 = vector.multi_reduction <add>, %79, %cst_30 [1] : vector<8x128xf32> to vector<8xf32>
    %81 = vector.shape_cast %80 : vector<8xf32> to vector<8x1xf32>
    %cst_31 = arith.constant 1.280000e+02 : f32
    %82 = vector.broadcast %cst_31 : f32 to vector<8x1xf32>
    %83 = arith.divf %81, %82 : vector<8x1xf32>
    %84 = vector.broadcast %83 : vector<8x1xf32> to vector<8x128xf32>
    %85 = arith.subf %79, %84 : vector<8x128xf32>
    %86 = arith.mulf %85, %85 : vector<8x128xf32>
    %cst_32 = arith.constant dense<0.000000e+00> : vector<8xf32>
    %87 = vector.multi_reduction <add>, %86, %cst_32 [1] : vector<8x128xf32> to vector<8xf32>
    %88 = vector.shape_cast %87 : vector<8xf32> to vector<8x1xf32>
    %cst_33 = arith.constant 1.280000e+02 : f32
    %89 = vector.broadcast %cst_33 : f32 to vector<8x1xf32>
    %90 = arith.divf %88, %89 : vector<8x1xf32>
    %cst_34 = arith.constant 9.99999974E-6 : f32
    %91 = vector.broadcast %cst_34 : f32 to vector<8x1xf32>
    %92 = arith.addf %90, %91 : vector<8x1xf32>
    %93 = math.rsqrt %92 : vector<8x1xf32>
    %94 = vector.broadcast %93 : vector<8x1xf32> to vector<8x128xf32>
    %95 = arith.mulf %85, %94 : vector<8x128xf32>
    %96 = vector.extract_strided_slice %76 {offsets = [1, 0], sizes = [1, 128], strides = [1, 1]} : vector<3x128xf32> to vector<1x128xf32>
    %97 = vector.broadcast %96 : vector<1x128xf32> to vector<8x128xf32>
    %98 = arith.mulf %95, %97 : vector<8x128xf32>
    %99 = vector.extract_strided_slice %76 {offsets = [2, 0], sizes = [1, 128], strides = [1, 1]} : vector<3x128xf32> to vector<1x128xf32>
    %100 = vector.broadcast %99 : vector<1x128xf32> to vector<8x128xf32>
    %101 = arith.addf %98, %100 : vector<8x128xf32>
    %102 = arith.negf %101 : vector<8x128xf32>
    %103 = math.exp %102 : vector<8x128xf32>
    %cst_35 = arith.constant 1.000000e+00 : f32
    %104 = vector.broadcast %cst_35 : f32 to vector<8x128xf32>
    %105 = arith.addf %104, %103 : vector<8x128xf32>
    %106 = arith.divf %104, %105 : vector<8x128xf32>
    %107 = arith.mulf %101, %106 : vector<8x128xf32>
    %108 = arith.addf %107, %71 : vector<8x128xf32>
    %c0_36 = arith.constant 0 : index
    %c0_37 = arith.constant 0 : index
    %109 = vector.load %arg5[%c0_36, %c0_37] : memref<128x32xf32, #tpu.memory_space<vmem>>, vector<128x32xf32>
    %cst_38 = arith.constant dense<0.000000e+00> : vector<8x32xf32>
    %110 = tpu.matmul %108, %109, %cst_38 {dimension_numbers = #tpu.dot_dimension_numbers<[1], [0], [0], [1], [0, 0, 1, 1], [], []>} : vector<8x128xf32>, vector<128x32xf32>, vector<8x32xf32> -> vector<8x32xf32>
    %c0_39 = arith.constant 0 : index
    %c0_40 = arith.constant 0 : index
    %111 = vector.load %arg6[%c0_39, %c0_40] : memref<3x32xf32, #tpu.memory_space<vmem>>, vector<3x32xf32>
    %112 = vector.extract_strided_slice %111 {offsets = [0, 0], sizes = [1, 32], strides = [1, 1]} : vector<3x32xf32> to vector<1x32xf32>
    %113 = vector.broadcast %112 : vector<1x32xf32> to vector<8x32xf32>
    %114 = arith.addf %110, %113 : vector<8x32xf32>
    %cst_41 = arith.constant dense<0.000000e+00> : vector<8xf32>
    %115 = vector.multi_reduction <add>, %114, %cst_41 [1] : vector<8x32xf32> to vector<8xf32>
    %116 = vector.shape_cast %115 : vector<8xf32> to vector<8x1xf32>
    %cst_42 = arith.constant 3.200000e+01 : f32
    %117 = vector.broadcast %cst_42 : f32 to vector<8x1xf32>
    %118 = arith.divf %116, %117 : vector<8x1xf32>
    %119 = vector.broadcast %118 : vector<8x1xf32> to vector<8x32xf32>
    %120 = arith.subf %114, %119 : vector<8x32xf32>
    %121 = arith.mulf %120, %120 : vector<8x32xf32>
    %cst_43 = arith.constant dense<0.000000e+00> : vector<8xf32>
    %122 = vector.multi_reduction <add>, %121, %cst_43 [1] : vector<8x32xf32> to vector<8xf32>
    %123 = vector.shape_cast %122 : vector<8xf32> to vector<8x1xf32>
    %cst_44 = arith.constant 3.200000e+01 : f32
    %124 = vector.broadcast %cst_44 : f32 to vector<8x1xf32>
    %125 = arith.divf %123, %124 : vector<8x1xf32>
    %cst_45 = arith.constant 9.99999974E-6 : f32
    %126 = vector.broadcast %cst_45 : f32 to vector<8x1xf32>
    %127 = arith.addf %125, %126 : vector<8x1xf32>
    %128 = math.rsqrt %127 : vector<8x1xf32>
    %129 = vector.broadcast %128 : vector<8x1xf32> to vector<8x32xf32>
    %130 = arith.mulf %120, %129 : vector<8x32xf32>
    %131 = vector.extract_strided_slice %111 {offsets = [1, 0], sizes = [1, 32], strides = [1, 1]} : vector<3x32xf32> to vector<1x32xf32>
    %132 = vector.broadcast %131 : vector<1x32xf32> to vector<8x32xf32>
    %133 = arith.mulf %130, %132 : vector<8x32xf32>
    %134 = vector.extract_strided_slice %111 {offsets = [2, 0], sizes = [1, 32], strides = [1, 1]} : vector<3x32xf32> to vector<1x32xf32>
    %135 = vector.broadcast %134 : vector<1x32xf32> to vector<8x32xf32>
    %136 = arith.addf %133, %135 : vector<8x32xf32>
    %cst_46 = arith.constant 0.000000e+00 : f32
    %137 = vector.broadcast %cst_46 : f32 to vector<8x32xf32>
    %138 = arith.maximumf %136, %137 : vector<8x32xf32>
    %c0_47 = arith.constant 0 : index
    %c0_48 = arith.constant 0 : index
    %139 = vector.load %arg7[%c0_47, %c0_48] : memref<8x32xf32, #tpu.memory_space<vmem>>, vector<8x32xf32>
    tpu.vector_store %arg7[%c0_47, %c0_48], %138 {strides = array<i32>} : memref<8x32xf32, #tpu.memory_space<vmem>>, vector<8x32xf32>,
    return
  }
}

</mosaic_0001>

<bundles_post_ra>
// kernel: tpu_custom_call.1
= control target key start
LH: loop header
LB: loop body
LE: loop exit
PB: predicated region body
PF: predicated region fallthrough
CT: control target
= control target key end

     0   :  { %12 = vsyncpa [#allocation3], 0  ;;  %s1073_s0 = inlined_call_operand.vmem [shape: f32[8,32], index: 0, kind: input, shape index: {}]   ;;  %s1074_s1 = inlined_call_operand.vmem [shape: f32[32,128], index: 1, kind: input, shape index: {}]   ;;  %s1075_s2 = inlined_call_operand.vmem [shape: f32[3,128], index: 2, kind: input, shape index: {}]   ;;  %s1076_s3 = inlined_call_operand.hbm [shape: f32[2,128,128], index: 3, kind: input, shape index: {}]   ;;  %s1077_s4 = inlined_call_operand.vmem [shape: f32[2,3,128], index: 4, kind: input, shape index: {}]   ;;  %s1078_s5 = inlined_call_operand.vmem [shape: f32[128,32], index: 5, kind: input, shape index: {}]   ;;  %s1079_s6 = inlined_call_operand.vmem [shape: f32[3,32], index: 6, kind: input, shape index: {}]   ;;  %s1080_s7 = inlined_call_operand.hbm [shape: f32[8,32], index: 7, kind: output, shape index: {}]  }
   0x1   :  { %13 = vsyncpa [#allocation4], 0  ;;  %s858_s24 = smov [#allocation2]   ;;  %s810_s28 = scalar_lea.hbm %s1076_s3, 4096 }
   0x2   :  { %s25_s25 = sshll.u32 %s858_s24, 4  ;;  %p811_p0 = scmp.ne.s32.totalorder %s1076_s3, %s810_s28  ;;  %s26_s25 = int_to_ptr.vmem [resolvable:$true] %s25_s25 }
   0x3   :  { %p814_p1 = scmp.lt.u32.totalorder %s810_s28, %s1076_s3 }
   0x5   :  { %p816_p2 = pnand %p814_p1, %p811_p0 }
   0x7   :  { %819 = shalt.err (!%p816_p2)
}
   0x8   :  { %s820_s10 = scalar_lea.vmem %s26_s25, 4096  ;;  %p825_p4 = scmp.lt.s32.totalorder %s26_s25, %s26_s25 }
   0x9   :  { %p821_p3 = scmp.ne.s32.totalorder %s26_s25, %s820_s10  ;;  %p826_p5 = scmp.lt.s32.totalorder %s820_s10, %s820_s10 }
   0xb   :  { %p827_p6 = por %p826_p5, %p825_p4 }
   0xd   :  { %p828_p7 = pnand %p827_p6, %p821_p3 }
   0xf   :  { %831 = shalt.err (!%p828_p7)
}
  0x10   :  { %s859_s11 = smov 128   ;;  %s860_s12 = smov 8  }
  0x11   :  { %31 = dma.hbm_to_vmem [thread:$0]  %s1076_s3, 4096, %s26_s25, [#allocation3], %s859_s11, %s859_s11, %s860_s12  }
  0x12   :  { %854 = dma.done.wait [#allocation3], 4096  }
  0x13   :  { %855 = vsyncadd [#allocation3], 4294963200  ;;  %v861_v0 = vmov 0.0|0.0   ;;  %vm862_vm0 = vmmov 0   ;;  %v863_v1 = vmov 0.0   ;;  %v42_v2 = vld [vmem:[%s1074_s1] sm:$0xff]  ;;  %v47_v9 = vlaneseq }
  0x14   :  { %705 = vmatprep.subr.bf16.mxu0 %v861_v0  ;;  %597 = vmatprep.mubr.msk.f32.mxu0 %vm862_vm0, %v863_v1  ;;  %v43_v3 = vld [vmem:[%s1074_s1 + $0x8] sm:$0xff]  ;;  %v44_v4 = vld [vmem:[%s1074_s1 + $0x10] sm:$0xff]  ;;  %v45_v6 = vld [vmem:[%s1074_s1 + $0x18] sm:$0xff]  ;;  %vm51_vm1 = vcmask 261120  }
  0x15   :  { %711 = vmatprep.subr.bf16.mxu1 %v861_v0  ;;  %632 = vmatprep.mubr.msk.f32.mxu1 %vm862_vm0, %v863_v1  ;;  %v706_v5 = vpack.c.bf16 %v43_v3, %v42_v2  ;;  %v709_v7 = vpack.c.bf16 %v45_v6, %v44_v4  ;;  %v41_v8 = vld [vmem:[%s1073_s0] sm:$0xff]  ;;  %v48_v10 = vshrl.u32 %v47_v9, 7  ;;  %v155_v22 = vld [vmem:[#allocation2 + $0x8] sm:$0xff]  ;;  %v156_v23 = vld [vmem:[#allocation2 + $0x10] sm:$0xff] }
  0x16   :  { %v948_v12 = vld [vmem:[%s1075_s2] sm:$0x7]  ;;  %v157_v25 = vld [vmem:[#allocation2 + $0x18] sm:$0xff]  ;;  %v159_v28 = vld [vmem:[#allocation2 + $0x28] sm:$0xff] }
  0x17   :  { %707 = vmatpush3.bf16.msra.mxu0 %v706_v5  ;;  %v943_v11 = vsub.s32 0, %v48_v10  ;;  %v154_v21 = vld [vmem:[#allocation2] sm:$0xff]  ;;  %v715_v26 = vpack.c.bf16 %v157_v25, %v156_v23  ;;  %v160_v30 = vld [vmem:[#allocation2 + $0x30] sm:$0xff]  ;;  %v161_v31 = vld [vmem:[#allocation2 + $0x38] sm:$0xff]  ;;  %v960_v48 = vsub.s32 1, %v48_v10  ;;  %v962_v49 = vsub.s32 2, %v48_v10 }
  0x18   :  { %708 = vmatprep.subr.bf16.mxu0 %v861_v0  ;;  %v712_v24 = vpack.c.bf16 %v155_v22, %v154_v21  ;;  %v158_v27 = vld [vmem:[#allocation2 + $0x20] sm:$0xff]  ;;  %v721_v32 = vpack.c.bf16 %v161_v31, %v160_v30  ;;  %v163_v34 = vld [vmem:[#allocation2 + $0x48] sm:$0xff]  ;;  %v164_v36 = vld [vmem:[#allocation2 + $0x50] sm:$0xff] }
  0x19   :  { %v50_v13 = vrot.slane %v948_v12, %v943_v11  ;;  %v718_v29 = vpack.c.bf16 %v159_v28, %v158_v27  ;;  %v162_v33 = vld [vmem:[#allocation2 + $0x40] sm:$0xff]  ;;  %v165_v37 = vld [vmem:[#allocation2 + $0x58] sm:$0xff]  ;;  %v167_v40 = vld [vmem:[#allocation2 + $0x68] sm:$0xff]  ;;  %v140_v50 = vrot.slane %v948_v12, %v960_v48  ;;  %v145_v52 = vrot.slane %v948_v12, %v962_v49 }
  0x1a   :  { %713 = vmatpush3.bf16.msra.mxu1 %v712_v24  ;;  %v724_v35 = vpack.c.bf16 %v163_v34, %v162_v33  ;;  %v727_v38 = vpack.c.bf16 %v165_v37, %v164_v36  ;;  %v166_v39 = vld [vmem:[#allocation2 + $0x60] sm:$0xff]  ;;  %v168_v42 = vld [vmem:[#allocation2 + $0x70] sm:$0xff]  ;;  %v169_v43 = vld [vmem:[#allocation2 + $0x78] sm:$0xff] }
  0x1b   :  { %710 = vmatpush3.bf16.msra.mxu0 %v709_v7  ;;  %714 = vmatprep.subr.bf16.mxu1 %v861_v0  ;;  %v730_v41 = vpack.c.bf16 %v167_v40, %v166_v39  ;;  %v733_v44 = vpack.c.bf16 %v169_v43, %v168_v42  ;;  %v170_v61 = vld [vmem:[%s1077_s4] sm:$0x7]  ;;  %v276_v9 = vld [vmem:[#allocation2 + $0x88] sm:$0xff]  ;;  %v277_v10 = vld [vmem:[#allocation2 + $0x90] sm:$0xff] }
  0x1c   :  { %735 = vmatprep.subr.bf16.mxu0 %v861_v0  ;;  %v174_v62 = vrot.slane %v170_v61, %v943_v11  ;;  %v284_v21 = vld [vmem:[#allocation2 + $0xc8] sm:$0xff]  ;;  %v285_v23 = vld [vmem:[#allocation2 + $0xd0] sm:$0xff]  ;;  %v286_v24 = vld [vmem:[#allocation2 + $0xd8] sm:$0xff]  ;;  %v264_v37 = vrot.slane %v170_v61, %v962_v49 }
  0x1d   :  { %v751_v25 = vpack.c.bf16 %v286_v24, %v285_v23  ;;  %v288_v27 = vld [vmem:[#allocation2 + $0xe8] sm:$0xff]  ;;  %v290_v30 = vld [vmem:[#allocation2 + $0xf8] sm:$0xff] }
  0x1e   :  { %598 = vmatmul.mubr.msk.f32.vlgmr.msra.gmra.mrb[0].mxu0 %vm51_vm1, %v41_v8  ;;  %716 = vmatpush3.bf16.msra.mxu1 %v715_v26  ;;  %v275_v8 = vld [vmem:[#allocation2 + $0x80] sm:$0xff] }
  0x1f   :  { %667 = vmatprep.mubr.msk.f32.mxu0 %vm862_vm0, %v863_v1  ;;  %717 = vmatprep.subr.bf16.mxu1 %v861_v0  ;;  %v736_v12 = vpack.c.bf16 %v276_v9, %v275_v8  ;;  %v287_v26 = vld [vmem:[#allocation2 + $0xe0] sm:$0xff]  ;;  %v405_v9 = vld [vmem:[%s1078_s5 + $0x48] sm:$0xff] }
  0x20   :  { %v754_v28 = vpack.c.bf16 %v288_v27, %v287_v26  ;;  %v404_v8 = vld [vmem:[%s1078_s5 + $0x40] sm:$0xff] }
  0x21   :  { %737 = vmatpush3.bf16.msra.mxu0 %v736_v12  ;;  %v406_v12 = vld [vmem:[%s1078_s5 + $0x50] sm:$0xff] }
  0x22   :  { %719 = vmatpush3.bf16.msra.mxu1 %v718_v29  ;;  %738 = vmatprep.subr.bf16.mxu0 %v861_v0  ;;  %v289_v29 = vld [vmem:[#allocation2 + $0xf0] sm:$0xff] }
  0x23   :  { %720 = vmatprep.subr.bf16.mxu1 %v861_v0  ;;  %v757_v31 = vpack.c.bf16 %v290_v30, %v289_v29 }
  0x26   :  { %722 = vmatpush3.bf16.msra.mxu1 %v721_v32 }
  0x27   :  { %723 = vmatprep.subr.bf16.mxu1 %v861_v0 }
  0x2a   :  { %725 = vmatpush3.bf16.msra.mxu1 %v724_v35  ;;  %v259_v35 = vrot.slane %v170_v61, %v960_v48 }
  0x2b   :  { %726 = vmatprep.subr.bf16.mxu1 %v861_v0 }
  0x2e   :  { %728 = vmatpush3.bf16.msra.mxu1 %v727_v38 }
  0x2f   :  { %729 = vmatprep.subr.bf16.mxu1 %v861_v0 }
  0x32   :  { %731 = vmatpush3.bf16.msra.mxu1 %v730_v41 }
  0x33   :  { %732 = vmatprep.subr.bf16.mxu1 %v861_v0 }
  0x36   :  { %734 = vmatpush3.bf16.msra.mxu1 %v733_v44 }
  0x37   :  { %759 = vmatprep.subr.bf16.mxu1 %v861_v0 }
  0xf1   :  { %v121_v14 = vpop.f32.mrb[0].mxu0 }
  0xf2   :  { %v122_v15 = vadd.f32 %v121_v14, %v50_v13  ;;  %v599_v16 = vpop.f32.mrb[1].mxu0  ;;  %v279_v14 = vld [vmem:[#allocation2 + $0xa0] sm:$0xff] }
  0xf4   :  { %125 = vadd.xlane.f32.xlu0 %v122_v15 }
 0x181   :  { %v126_v17 = vpop.xlane.xlu0 %125 }
 0x182   :  { %v128_v18 = vmul.f32 0.0078125, %v126_v17  ;;  %v281_v17 = vld [vmem:[#allocation2 + $0xb0] sm:$0xff] }
 0x184   :  { %v129_v19 = vsub.f32 %v122_v15, %v128_v18  ;;  %v280_v15 = vld [vmem:[#allocation2 + $0xa8] sm:$0xff]  ;;  %v282_v18 = vld [vmem:[#allocation2 + $0xb8] sm:$0xff] }
 0x185   :  { %v742_v16 = vpack.c.bf16 %v280_v15, %v279_v14  ;;  %v408_v14 = vld [vmem:[%s1078_s5 + $0x60] sm:$0xff]  ;;  %v409_v15 = vld [vmem:[%s1078_s5 + $0x68] sm:$0xff] }
 0x186   :  { %v130_v20 = vmul.f32 %v129_v19, %v129_v19 }
 0x188   :  { %131 = vadd.xlane.f32.xlu0 %v130_v20  ;;  %v283_v20 = vld [vmem:[#allocation2 + $0xc0] sm:$0xff] }
 0x189   :  { %v748_v22 = vpack.c.bf16 %v284_v21, %v283_v20 }
 0x215   :  { %v132_v45 = vpop.xlane.xlu0 %131 }
 0x216   :  { %v133_v46 = vmul.f32 0.0078125, %v132_v45 }
 0x218   :  { %v134_v47 = vadd.f32 1e-05, %v133_v46 }
 0x21a   :  { %790 = vrsqrt.f32 %v134_v47  ;;  %v531_v47 = vld [vmem:[%s1077_s4 + $0x4] sm:$0x7] }
 0x21b   :  { %v381_v23 = vrot.slane %v531_v47, %v960_v48 }
 0x224   :  { %v791_v51 = vpop.eup %790 }
 0x225   :  { %v136_v53 = vmul.f32 %v791_v51, %v129_v19  ;;  %v745_v19 = vpack.c.bf16 %v282_v18, %v281_v17  ;;  %v410_v17 = vld [vmem:[%s1078_s5 + $0x70] sm:$0xff]  ;;  %v411_v18 = vld [vmem:[%s1078_s5 + $0x78] sm:$0xff] }
 0x227   :  { %v141_v54 = vmul.f32 %v140_v50, %v136_v53  ;;  %v296_v50 = vrot.slane %v531_v47, %v943_v11 }
 0x229   :  { %v146_v55 = vadd.f32 %v145_v52, %v141_v54 }
 0x22b   :  { %v529_v56 = vmul.f32 -1.442695, %v146_v55 }
 0x22d   :  { %792 = vpow2.f32 %v529_v56 }
 0x237   :  { %v793_v57 = vpop.eup %792 }
 0x238   :  { %v150_v58 = vadd.f32 1.0, %v793_v57 }
 0x23a   :  { %794 = vrcp.f32 %v150_v58  ;;  %v396_v58 = vld [vmem:[%s1078_s5] sm:$0xff] }
 0x244   :  { %v795_v59 = vpop.eup %794 }
 0x245   :  { %v968_v60 = vmul.f32 %v795_v59, %v146_v55  ;;  %v397_v59 = vld [vmem:[%s1078_s5 + $0x8] sm:$0xff] }
 0x246   :  { %v760_v61 = vpack.c.bf16 %v397_v59, %v396_v58 }
 0x247   :  { %633 = vmatmul.mubr.f32.vlgmr.msra.gmra.mrb[0].mxu1 %v968_v60 }
 0x248   :  { %702 = vmatprep.mubr.msk.f32.mxu1 %vm862_vm0, %v863_v1  ;;  %v278_v1 = vld [vmem:[#allocation2 + $0x98] sm:$0xff]  ;;  %761 = vmatpush3.bf16.msra.mxu1 %v760_v61 }
 0x249   :  { %v739_v13 = vpack.c.bf16 %v278_v1, %v277_v10  ;;  %762 = vmatprep.subr.bf16.mxu1 %v861_v0  ;;  %v772_v10 = vpack.c.bf16 %v405_v9, %v404_v8  ;;  %v407_v1 = vld [vmem:[%s1078_s5 + $0x58] sm:$0xff] }
 0x24b   :  { %740 = vmatpush3.bf16.msra.mxu0 %v739_v13  ;;  %v775_v13 = vpack.c.bf16 %v407_v1, %v406_v12 }
 0x24c   :  { %741 = vmatprep.subr.bf16.mxu0 %v861_v0 }
 0x24f   :  { %743 = vmatpush3.bf16.msra.mxu0 %v742_v16  ;;  %v778_v16 = vpack.c.bf16 %v409_v15, %v408_v14 }
 0x250   :  { %744 = vmatprep.subr.bf16.mxu0 %v861_v0 }
 0x253   :  { %746 = vmatpush3.bf16.msra.mxu0 %v745_v19  ;;  %v781_v19 = vpack.c.bf16 %v411_v18, %v410_v17 }
 0x254   :  { %747 = vmatprep.subr.bf16.mxu0 %v861_v0 }
 0x257   :  { %749 = vmatpush3.bf16.msra.mxu0 %v748_v22 }
 0x258   :  { %750 = vmatprep.subr.bf16.mxu0 %v861_v0 }
 0x25b   :  { %752 = vmatpush3.bf16.msra.mxu0 %v751_v25  ;;  %v386_v25 = vrot.slane %v531_v47, %v962_v49 }
 0x25c   :  { %753 = vmatprep.subr.bf16.mxu0 %v861_v0 }
 0x25f   :  { %755 = vmatpush3.bf16.msra.mxu0 %v754_v28 }
 0x260   :  { %756 = vmatprep.subr.bf16.mxu0 %v861_v0 }
 0x263   :  { %758 = vmatpush3.bf16.msra.mxu0 %v757_v31 }
 0x31a   :  { %v241_v63 = vpop.f32.mrb[0].mxu1 }
 0x31b   :  { %v242_v2 = vadd.f32 %v241_v63, %v174_v62  ;;  %v634_v3 = vpop.f32.mrb[1].mxu1  ;;  %v399_v62 = vld [vmem:[%s1078_s5 + $0x18] sm:$0xff] }
 0x31c   :  { %v401_v3 = vld [vmem:[%s1078_s5 + $0x28] sm:$0xff] }
 0x31d   :  { %245 = vadd.xlane.f32.xlu1 %v242_v2 }
 0x3aa   :  { %v246_v4 = vpop.xlane.xlu1 %245 }
 0x3ab   :  { %v247_v5 = vmul.f32 0.0078125, %v246_v4 }
 0x3ad   :  { %v248_v6 = vsub.f32 %v242_v2, %v247_v5  ;;  %v400_v2 = vld [vmem:[%s1078_s5 + $0x20] sm:$0xff]  ;;  %v402_v5 = vld [vmem:[%s1078_s5 + $0x30] sm:$0xff] }
 0x3ae   :  { %v766_v4 = vpack.c.bf16 %v401_v3, %v400_v2 }
 0x3af   :  { %v249_v7 = vmul.f32 %v248_v6, %v248_v6 }
 0x3b1   :  { %250 = vadd.xlane.f32.xlu1 %v249_v7 }
 0x43e   :  { %v251_v32 = vpop.xlane.xlu1 %250 }
 0x43f   :  { %v252_v33 = vmul.f32 0.0078125, %v251_v32 }
 0x441   :  { %v253_v34 = vadd.f32 1e-05, %v252_v33 }
 0x443   :  { %796 = vrsqrt.f32 %v253_v34  ;;  %v412_v34 = vld [vmem:[%s1079_s6] sm:$0x7]  ;;  %s864_s6 = smov [#allocation5]  }
 0x444   :  { %s519_s8 = sshll.u32 %s864_s6, 4  ;;  %s520_s8 = int_to_ptr.vmem [resolvable:$true] %s519_s8 }
 0x445   :  { %s832_s9 = scalar_lea.vmem %s520_s8, 128  ;;  %p837_p9 = scmp.lt.s32.totalorder %s520_s8, %s520_s8 }
 0x446   :  { %p833_p8 = scmp.ne.s32.totalorder %s520_s8, %s832_s9  ;;  %p838_p10 = scmp.lt.s32.totalorder %s832_s9, %s832_s9 }
 0x448   :  { %p839_p11 = por %p838_p10, %p837_p9 }
 0x44a   :  { %p840_p12 = pnand %p839_p11, %p833_p8 }
 0x44d   :  { %v797_v36 = vpop.eup %796 }
 0x44e   :  { %v255_v38 = vmul.f32 %v797_v36, %v248_v6  ;;  %v403_v6 = vld [vmem:[%s1078_s5 + $0x38] sm:$0xff] }
 0x44f   :  { %v769_v7 = vpack.c.bf16 %v403_v6, %v402_v5 }
 0x450   :  { %v260_v39 = vmul.f32 %v259_v35, %v255_v38  ;;  %v416_v35 = vrot.slane %v412_v34, %v943_v11 }
 0x452   :  { %v265_v40 = vadd.f32 %v264_v37, %v260_v39 }
 0x454   :  { %v530_v41 = vmul.f32 -1.442695, %v265_v40 }
 0x456   :  { %798 = vpow2.f32 %v530_v41 }
 0x460   :  { %v799_v42 = vpop.eup %798 }
 0x461   :  { %v269_v43 = vadd.f32 1.0, %v799_v42 }
 0x463   :  { %800 = vrcp.f32 %v269_v43 }
 0x46d   :  { %v801_v44 = vpop.eup %800 }
 0x46e   :  { %v272_v45 = vmul.f32 %v801_v44, %v265_v40 }
 0x470   :  { %v987_v46 = vadd.f32 %v272_v45, %v968_v60  ;;  %v398_v60 = vld [vmem:[%s1078_s5 + $0x10] sm:$0xff] }
 0x471   :  { %v763_v63 = vpack.c.bf16 %v399_v62, %v398_v60 }
 0x472   :  { %668 = vmatmul.mubr.f32.vlgmr.msra.gmra.mrb[2].mxu0 %v987_v46 }
 0x473   :  { %764 = vmatpush3.bf16.msra.mxu1 %v763_v63 }
 0x474   :  { %765 = vmatprep.subr.bf16.mxu1 %v861_v0 }
 0x477   :  { %767 = vmatpush3.bf16.msra.mxu1 %v766_v4 }
 0x478   :  { %768 = vmatprep.subr.bf16.mxu1 %v861_v0 }
 0x47b   :  { %770 = vmatpush3.bf16.msra.mxu1 %v769_v7 }
 0x47c   :  { %771 = vmatprep.subr.bf16.mxu1 %v861_v0 }
 0x47f   :  { %773 = vmatpush3.bf16.msra.mxu1 %v772_v10 }
 0x480   :  { %774 = vmatprep.subr.bf16.mxu1 %v861_v0 }
 0x483   :  { %776 = vmatpush3.bf16.msra.mxu1 %v775_v13 }
 0x484   :  { %777 = vmatprep.subr.bf16.mxu1 %v861_v0 }
 0x487   :  { %779 = vmatpush3.bf16.msra.mxu1 %v778_v16 }
 0x488   :  { %780 = vmatprep.subr.bf16.mxu1 %v861_v0 }
 0x48b   :  { %782 = vmatpush3.bf16.msra.mxu1 %v781_v19 }
 0x545   :  { %v363_v51 = vpop.f32.mrb[2].mxu0 }
 0x546   :  { %v364_v52 = vadd.f32 %v363_v51, %v296_v50  ;;  %v669_v53 = vpop.f32.mrb[3].mxu0  ;;  %v504_v50 = vrot.slane %v412_v34, %v960_v48  ;;  %v509_v51 = vrot.slane %v412_v34, %v962_v49 }
 0x548   :  { %367 = vadd.xlane.f32.xlu0 %v364_v52 }
 0x5d5   :  { %v368_v54 = vpop.xlane.xlu0 %367 }
 0x5d6   :  { %v369_v55 = vmul.f32 0.0078125, %v368_v54 }
 0x5d8   :  { %v370_v56 = vsub.f32 %v364_v52, %v369_v55 }
 0x5da   :  { %v371_v57 = vmul.f32 %v370_v56, %v370_v56 }
 0x5dc   :  { %372 = vadd.xlane.f32.xlu1 %v371_v57 }
 0x669   :  { %v373_v20 = vpop.xlane.xlu1 %372 }
 0x66a   :  { %v374_v21 = vmul.f32 0.0078125, %v373_v20 }
 0x66c   :  { %v375_v22 = vadd.f32 1e-05, %v374_v21 }
 0x66e   :  { %802 = vrsqrt.f32 %v375_v22 }
 0x678   :  { %v803_v24 = vpop.eup %802 }
 0x679   :  { %v377_v26 = vmul.f32 %v803_v24, %v370_v56 }
 0x67b   :  { %v382_v27 = vmul.f32 %v381_v23, %v377_v26 }
 0x67d   :  { %v387_v28 = vadd.f32 %v386_v25, %v382_v27 }
 0x67f   :  { %v532_v29 = vmul.f32 -1.442695, %v387_v28 }
 0x681   :  { %804 = vpow2.f32 %v532_v29 }
 0x68b   :  { %v805_v30 = vpop.eup %804 }
 0x68c   :  { %v391_v31 = vadd.f32 1.0, %v805_v30 }
 0x68e   :  { %806 = vrcp.f32 %v391_v31 }
 0x698   :  { %v807_v32 = vpop.eup %806 }
 0x699   :  { %v394_v0 = vmul.f32 %v807_v32, %v387_v28 }
 0x69b   :  { %v395_v33 = vadd.f32 %v394_v0, %v987_v46 }
 0x69d   :  { %703 = vmatmul.mubr.f32.vlgmr.msra.gmra.mrb[2].mxu1 %v395_v33 }
 0x770   :  { %v483_v36 = vpop.f32.mrb[2].mxu1 }
 0x771   :  { %v484_v37 = vadd.f32 %v483_v36, %v416_v35  ;;  %v704_v38 = vpop.f32.mrb[3].mxu1 }
 0x773   :  { %v487_v39 = vsel %vm51_vm1, %v484_v37, 0.0 }
 0x774   :  { %488 = vadd.xlane.f32.xlu0 %v487_v39 }
 0x801   :  { %v489_v40 = vpop.xlane.xlu0 %488 }
 0x802   :  { %v491_v41 = vmul.f32 0.03125, %v489_v40 }
 0x804   :  { %v492_v42 = vsub.f32 %v484_v37, %v491_v41 }
 0x806   :  { %v493_v43 = vmul.f32 %v492_v42, %v492_v42 }
 0x808   :  { %v494_v44 = vsel %vm51_vm1, %v493_v43, 0.0 }
 0x809   :  { %495 = vadd.xlane.f32.xlu1 %v494_v44 }
 0x896   :  { %v496_v45 = vpop.xlane.xlu1 %495 }
 0x897   :  { %v497_v46 = vmul.f32 0.03125, %v496_v45 }
 0x899   :  { %v498_v47 = vadd.f32 1e-05, %v497_v46 }
 0x89b   :  { %808 = vrsqrt.f32 %v498_v47 }
 0x8a5   :  { %v809_v11 = vpop.eup %808 }
 0x8a6   :  { %v500_v52 = vmul.f32 %v809_v11, %v492_v42 }
 0x8a8   :  { %v505_v53 = vmul.f32 %v504_v50, %v500_v52 }
 0x8aa   :  { %v510_v54 = vadd.f32 %v509_v51, %v505_v53 }
 0x8ac   :  { %v511_v55 = vmax.f32 %v510_v54, 0.0 }
 0x8ae   :  { %512 = vst.msk [vmem:[#allocation5] sm:$0xff] %vm51_vm1, %v511_v55 }
 0x8af   :  { %843 = shalt.err (!%p840_p12)
}
 0x8b0   :  { %s844_s12 = scalar_lea.hbm %s1080_s7, 128 }
 0x8b1   :  { %p845_p13 = scmp.ne.s32.totalorder %s1080_s7, %s844_s12  ;;  %p848_p0 = scmp.lt.u32.totalorder %s844_s12, %s1080_s7 }
 0x8b3   :  { %p850_p1 = pnand %p848_p0, %p845_p13 }
 0x8b5   :  { %853 = shalt.err (!%p850_p1)
}
 0x8b6   :  { %522 = dma.vmem_to_hbm [thread:$0]  %s520_s8, 128, %s1080_s7, [#allocation4]  }
 0x8b7   :  { %856 = dma.done.wait [#allocation4], 128  }
 0x8b8   :  { %857 = vsyncadd [#allocation4], 4294967168 }
 0x8b9   :  { %526 = vsyncpa [#allocation3], 1 }
 0x8ba   :  { %527 = vsyncpa [#allocation4], 1 }

</bundles_post_ra>
